<compile_context>
chip_gen: v5e
topology: v5e:2x2
jax: 0.10.0
libtpu: 0.0.40
codegen_flags: <defaults>
</compile_context>

<pallas_src>
import functools

import jax
import jax.numpy as jnp
from jax import lax
from jax.experimental import pallas as pl
from jax.experimental.pallas import tpu as pltpu


# ----------------------------------------------------------------------------
# Primary path: VMEM-resident codebook, TN rows gathered per grid step.
# ----------------------------------------------------------------------------
def _gather_resident_kernel(idx_ref, code_ref, out_ref, *, tn, unroll):
    # idx_ref : SMEM scalar-prefetch ref, shape (n_pad,)
    # code_ref: full codebook, VMEM-resident (constant index_map)
    # out_ref : (tn, D) lane-dense output tile
    base = pl.program_id(0) * tn

    def body(j, carry):
        row = idx_ref[base + j]
        out_ref[pl.ds(j, 1), :] = code_ref[pl.ds(row, 1), :]
        return carry

    lax.fori_loop(0, tn, body, 0, unroll=unroll)


def _gather_vmem_resident(code2d, idx_flat, tn, vmem_limit_bytes):
    num_embeddings, D = code2d.shape
    n = int(idx_flat.shape[0])
    itemsize = code2d.dtype.itemsize

    # Pad the index list to a multiple of TN (padded rows gather row 0 and are
    # sliced off afterwards).
    n_pad = int(pl.cdiv(n, tn)) * tn
    if n_pad != n:
        idx_flat = jnp.concatenate(
            [idx_flat, jnp.zeros((n_pad - n,), dtype=jnp.int32)]
        )

    grid_spec = pltpu.PrefetchScalarGridSpec(
        num_scalar_prefetch=1,
        grid=(n_pad // tn,),
        in_specs=[
            # Whole codebook as one block with a constant index_map -> DMA'd
            # into VMEM once and revisited across all grid steps.
            pl.BlockSpec((num_embeddings, D), lambda i, idx_ref: (0, 0)),
        ],
        out_specs=pl.BlockSpec((tn, D), lambda i, idx_ref: (i, 0)),
    )

    bytes_accessed = (num_embeddings * D + n_pad * D) * itemsize
    out2d = pl.pallas_call(
        functools.partial(_gather_resident_kernel, tn=tn, unroll=(tn <= 16)),
        out_shape=jax.ShapeDtypeStruct((n_pad, D), code2d.dtype),
        grid_spec=grid_spec,
        compiler_params=pltpu.CompilerParams(
            dimension_semantics=("parallel",),
            vmem_limit_bytes=int(vmem_limit_bytes),
        ),
        cost_estimate=pl.CostEstimate(
            flops=0, transcendentals=0, bytes_accessed=int(bytes_accessed)
        ),
    )(idx_flat, code2d)
    return out2d[:n]


# ----------------------------------------------------------------------------
# Fallback path: per-row data-dependent DMA gather (large codebooks).
# ----------------------------------------------------------------------------
def _copy_kernel(idx_ref, code_ref, out_ref):
    # Row selection happens in the BlockSpec index_map; body is a lane-dense copy.
    del idx_ref
    out_ref[...] = code_ref[...]


def _gather_hbm_dma(code2d, idx_flat):
    num_embeddings, D = code2d.shape
    n = int(idx_flat.shape[0])
    itemsize = code2d.dtype.itemsize
    # (num_embeddings, 1, D) so the (1, 1, D) block trivially satisfies the
    # (8, 128) tiling rule while staying lane-dense (contiguous D-wide row DMA).
    code3d = code2d.reshape(num_embeddings, 1, D)

    grid_spec = pltpu.PrefetchScalarGridSpec(
        num_scalar_prefetch=1,
        grid=(n,),
        in_specs=[
            pl.BlockSpec((1, 1, D), lambda i, idx_ref: (idx_ref[i], 0, 0)),
        ],
        out_specs=pl.BlockSpec((1, 1, D), lambda i, idx_ref: (i, 0, 0)),
    )

    out3d = pl.pallas_call(
        _copy_kernel,
        out_shape=jax.ShapeDtypeStruct((n, 1, D), code2d.dtype),
        grid_spec=grid_spec,
        compiler_params=pltpu.CompilerParams(
            dimension_semantics=("arbitrary",)
        ),
        cost_estimate=pl.CostEstimate(
            flops=0, transcendentals=0, bytes_accessed=int(2 * n * D * itemsize)
        ),
    )(idx_flat, code3d)
    return out3d.reshape(n, D)


# ----------------------------------------------------------------------------
# Wrapper: Embedding.forward equivalent.
# ----------------------------------------------------------------------------
def _choose_tn(n):
    for tn in (64, 32, 16, 8):
        if n >= tn:
            return tn
    return 8


def embedding_forward(code, idx=None, *, tn=None):
    """Pallas equivalent of Embedding.forward.

    code: [num_embeddings, C, H, W]
    idx : integer array of any shape (or None)
    returns: code if idx is None, else code[idx].reshape(-1, C, H, W)
    """
    if idx is None:
        return code

    num_embeddings, C, H, W = code.shape
    D = C * H * W

    idx_flat = jnp.asarray(idx, dtype=jnp.int32).reshape(-1)
    n = int(idx_flat.shape[0])
    if n == 0:
        return jnp.zeros((0, C, H, W), dtype=code.dtype)

    # Clamp: an out-of-range index would otherwise drive a DMA off the codebook.
    idx_flat = jnp.clip(idx_flat, 0, num_embeddings - 1)

    code2d = code.reshape(num_embeddings, D)
    itemsize = jnp.dtype(code.dtype).itemsize
    if tn is None:
        tn = _choose_tn(n)

    # VMEM budget: codebook (assume 2 buffers) + double-buffered output tile
    # + headroom. Use the resident path only when it fits comfortably within
    # the smallest per-core VMEM (v7x: 64 MiB physical).
    code_bytes = num_embeddings * D * itemsize
    out_block_bytes = tn * D * itemsize
    budget_needed = 2 * code_bytes + 2 * out_block_bytes + (2 << 20)

    if budget_needed <= (48 << 20):
        vmem_limit = min(max(budget_needed, 32 << 20), 56 << 20)
        out2d = _gather_vmem_resident(code2d, idx_flat, tn, vmem_limit)
    else:
        out2d = _gather_hbm_dma(code2d, idx_flat)

    return out2d.reshape(-1, C, H, W)


if __name__ == "__main__":
    # Small shapes consistent with the module.
    num_embeddings, C, H, W = 8, 4, 16, 16

    key = jax.random.PRNGKey(0)
    k_code, k_idx, k_idx2 = jax.random.split(key, 3)

    # Faithful to the PyTorch __init__: code = randn(...) * 0.0 (all zeros).
    code = jax.random.normal(k_code, (num_embeddings, C, H, W), jnp.float32) * 0.0

    # idx with an extra leading dim to exercise the .view(-1, C, H, W) semantics.
    idx = jax.random.randint(k_idx, (2, 3), 0, num_embeddings, dtype=jnp.int32)

    # idx=None path: returns the raw codebook.
    out_none = embedding_forward(code, None)
    assert out_none.shape == (num_embeddings, C, H, W)

    # Gather path on the (zero) parameter.
    out = jax.block_until_ready(embedding_forward(code, idx))
    assert out.shape == (idx.size, C, H, W)
    assert out.dtype == jnp.float32
    ref_zero = code[idx.reshape(-1)].reshape(-1, C, H, W)
    assert jnp.allclose(out, ref_zero)

    # Sanity-check the gather against a plain-JAX reference using a non-zero
    # codebook (zeros would make any gather look correct).
    code_nz = jax.random.normal(k_code, (num_embeddings, C, H, W), jnp.float32)
    out_nz = jax.block_until_ready(embedding_forward(code_nz, idx))
    ref = code_nz[idx.reshape(-1)].reshape(-1, C, H, W)
    assert jnp.allclose(out_nz, ref), "Pallas gather mismatch vs reference"

    # Larger index set: exercises TN batching + padding (+ slice-back).
    idx2 = jax.random.randint(k_idx2, (5, 7), 0, num_embeddings, dtype=jnp.int32)
    out2 = jax.block_until_ready(embedding_forward(code_nz, idx2))
    ref2 = code_nz[idx2.reshape(-1)].reshape(-1, C, H, W)
    assert out2.shape == (idx2.size, C, H, W)
    assert jnp.allclose(out2, ref2), "Pallas batched gather mismatch vs reference"

    # Fallback (per-row HBM DMA) path correctness.
    out_fb = jax.block_until_ready(
        _gather_hbm_dma(
            code_nz.reshape(num_embeddings, C * H * W),
            jnp.clip(idx.reshape(-1).astype(jnp.int32), 0, num_embeddings - 1),
        )
    ).reshape(-1, C, H, W)
    assert jnp.allclose(out_fb, ref), "Pallas DMA-fallback gather mismatch"

    print("KERNEL_OK")
</pallas_src>

<mosaic_0001>
module attributes {stable_mosaic.version = 11 : i64} {
  func.func @_gather_resident_kernel(%arg0: i32, %arg1: memref<8xi32, #tpu.memory_space<smem>>, %arg2: memref<8x1024xf32, #tpu.memory_space<vmem>>, %arg3: memref<8x1024xf32, #tpu.memory_space<vmem>>) attributes {dimension_semantics = [#tpu.dimension_semantics<parallel>], iteration_bounds = array<i64: 1>, scalar_prefetch = 1 : i64, scratch_operands = 0 : i64, tpu.core_type = #tpu.core_type<tc>, window_params = [{pipeline_mode = #tpu.pipeline_mode<synchronous>, transform_indices = @transform_0, window_bounds = array<i64: 8, 1024>}, {transform_indices = @transform_1, window_bounds = array<i64: 8, 1024>}]} {
    %c8_i32 = arith.constant 8 : i32
    %0 = arith.muli %arg0, %c8_i32 : i32
    %c0_i32 = arith.constant 0 : i32
    %1 = arith.addi %0, %c0_i32 : i32
    %2 = arith.index_cast %1 : i32 to index
    %3 = memref.load %arg1[%2] : memref<8xi32, #tpu.memory_space<smem>>
    %4 = arith.index_cast %3 : i32 to index
    %c0 = arith.constant 0 : index
    %5 = vector.load %arg2[%4, %c0] : memref<8x1024xf32, #tpu.memory_space<vmem>>, vector<1x1024xf32>
    %6 = arith.index_cast %c0_i32 : i32 to index
    %c0_0 = arith.constant 0 : index
    %7 = vector.load %arg3[%6, %c0_0] : memref<8x1024xf32, #tpu.memory_space<vmem>>, vector<1x1024xf32>
    tpu.vector_store %arg3[%6, %c0_0], %5 {strides = array<i32>} : memref<8x1024xf32, #tpu.memory_space<vmem>>, vector<1x1024xf32>,
    %c1_i32 = arith.constant 1 : i32
    %8 = arith.addi %0, %c1_i32 : i32
    %9 = arith.index_cast %8 : i32 to index
    %10 = memref.load %arg1[%9] : memref<8xi32, #tpu.memory_space<smem>>
    %11 = arith.index_cast %10 : i32 to index
    %c0_1 = arith.constant 0 : index
    %12 = vector.load %arg2[%11, %c0_1] : memref<8x1024xf32, #tpu.memory_space<vmem>>, vector<1x1024xf32>
    %13 = arith.index_cast %c1_i32 : i32 to index
    %c0_2 = arith.constant 0 : index
    %14 = vector.load %arg3[%13, %c0_2] : memref<8x1024xf32, #tpu.memory_space<vmem>>, vector<1x1024xf32>
    tpu.vector_store %arg3[%13, %c0_2], %12 {strides = array<i32>} : memref<8x1024xf32, #tpu.memory_space<vmem>>, vector<1x1024xf32>,
    %c2_i32 = arith.constant 2 : i32
    %15 = arith.addi %0, %c2_i32 : i32
    %16 = arith.index_cast %15 : i32 to index
    %17 = memref.load %arg1[%16] : memref<8xi32, #tpu.memory_space<smem>>
    %18 = arith.index_cast %17 : i32 to index
    %c0_3 = arith.constant 0 : index
    %19 = vector.load %arg2[%18, %c0_3] : memref<8x1024xf32, #tpu.memory_space<vmem>>, vector<1x1024xf32>
    %20 = arith.index_cast %c2_i32 : i32 to index
    %c0_4 = arith.constant 0 : index
    %21 = vector.load %arg3[%20, %c0_4] : memref<8x1024xf32, #tpu.memory_space<vmem>>, vector<1x1024xf32>
    tpu.vector_store %arg3[%20, %c0_4], %19 {strides = array<i32>} : memref<8x1024xf32, #tpu.memory_space<vmem>>, vector<1x1024xf32>,
    %c3_i32 = arith.constant 3 : i32
    %22 = arith.addi %0, %c3_i32 : i32
    %23 = arith.index_cast %22 : i32 to index
    %24 = memref.load %arg1[%23] : memref<8xi32, #tpu.memory_space<smem>>
    %25 = arith.index_cast %24 : i32 to index
    %c0_5 = arith.constant 0 : index
    %26 = vector.load %arg2[%25, %c0_5] : memref<8x1024xf32, #tpu.memory_space<vmem>>, vector<1x1024xf32>
    %27 = arith.index_cast %c3_i32 : i32 to index
    %c0_6 = arith.constant 0 : index
    %28 = vector.load %arg3[%27, %c0_6] : memref<8x1024xf32, #tpu.memory_space<vmem>>, vector<1x1024xf32>
    tpu.vector_store %arg3[%27, %c0_6], %26 {strides = array<i32>} : memref<8x1024xf32, #tpu.memory_space<vmem>>, vector<1x1024xf32>,
    %c4_i32 = arith.constant 4 : i32
    %29 = arith.addi %0, %c4_i32 : i32
    %30 = arith.index_cast %29 : i32 to index
    %31 = memref.load %arg1[%30] : memref<8xi32, #tpu.memory_space<smem>>
    %32 = arith.index_cast %31 : i32 to index
    %c0_7 = arith.constant 0 : index
    %33 = vector.load %arg2[%32, %c0_7] : memref<8x1024xf32, #tpu.memory_space<vmem>>, vector<1x1024xf32>
    %34 = arith.index_cast %c4_i32 : i32 to index
    %c0_8 = arith.constant 0 : index
    %35 = vector.load %arg3[%34, %c0_8] : memref<8x1024xf32, #tpu.memory_space<vmem>>, vector<1x1024xf32>
    tpu.vector_store %arg3[%34, %c0_8], %33 {strides = array<i32>} : memref<8x1024xf32, #tpu.memory_space<vmem>>, vector<1x1024xf32>,
    %c5_i32 = arith.constant 5 : i32
    %36 = arith.addi %0, %c5_i32 : i32
    %37 = arith.index_cast %36 : i32 to index
    %38 = memref.load %arg1[%37] : memref<8xi32, #tpu.memory_space<smem>>
    %39 = arith.index_cast %38 : i32 to index
    %c0_9 = arith.constant 0 : index
    %40 = vector.load %arg2[%39, %c0_9] : memref<8x1024xf32, #tpu.memory_space<vmem>>, vector<1x1024xf32>
    %41 = arith.index_cast %c5_i32 : i32 to index
    %c0_10 = arith.constant 0 : index
    %42 = vector.load %arg3[%41, %c0_10] : memref<8x1024xf32, #tpu.memory_space<vmem>>, vector<1x1024xf32>
    tpu.vector_store %arg3[%41, %c0_10], %40 {strides = array<i32>} : memref<8x1024xf32, #tpu.memory_space<vmem>>, vector<1x1024xf32>,
    %c6_i32 = arith.constant 6 : i32
    %43 = arith.addi %0, %c6_i32 : i32
    %44 = arith.index_cast %43 : i32 to index
    %45 = memref.load %arg1[%44] : memref<8xi32, #tpu.memory_space<smem>>
    %46 = arith.index_cast %45 : i32 to index
    %c0_11 = arith.constant 0 : index
    %47 = vector.load %arg2[%46, %c0_11] : memref<8x1024xf32, #tpu.memory_space<vmem>>, vector<1x1024xf32>
    %48 = arith.index_cast %c6_i32 : i32 to index
    %c0_12 = arith.constant 0 : index
    %49 = vector.load %arg3[%48, %c0_12] : memref<8x1024xf32, #tpu.memory_space<vmem>>, vector<1x1024xf32>
    tpu.vector_store %arg3[%48, %c0_12], %47 {strides = array<i32>} : memref<8x1024xf32, #tpu.memory_space<vmem>>, vector<1x1024xf32>,
    %c7_i32 = arith.constant 7 : i32
    %50 = arith.addi %0, %c7_i32 : i32
    %51 = arith.index_cast %50 : i32 to index
    %52 = memref.load %arg1[%51] : memref<8xi32, #tpu.memory_space<smem>>
    %53 = arith.index_cast %52 : i32 to index
    %c0_13 = arith.constant 0 : index
    %54 = vector.load %arg2[%53, %c0_13] : memref<8x1024xf32, #tpu.memory_space<vmem>>, vector<1x1024xf32>
    %55 = arith.index_cast %c7_i32 : i32 to index
    %c0_14 = arith.constant 0 : index
    %56 = vector.load %arg3[%55, %c0_14] : memref<8x1024xf32, #tpu.memory_space<vmem>>, vector<1x1024xf32>
    tpu.vector_store %arg3[%55, %c0_14], %54 {strides = array<i32>} : memref<8x1024xf32, #tpu.memory_space<vmem>>, vector<1x1024xf32>,
    %c8_i32_15 = arith.constant 8 : i32
    return
  }
  func.func @transform_0(%arg0: i32, %arg1: memref<8xi32, #tpu.memory_space<smem>>) -> (i32, i32) {
    %c0_i32 = arith.constant 0 : i32
    %c0_i32_0 = arith.constant 0 : i32
    %c0_i32_1 = arith.constant 0 : i32
    return %c0_i32, %c0_i32_0 : i32, i32
  }
  func.func @transform_1(%arg0: i32, %arg1: memref<8xi32, #tpu.memory_space<smem>>) -> (i32, i32) {
    %c0_i32 = arith.constant 0 : i32
    %c0_i32_0 = arith.constant 0 : i32
    return %arg0, %c0_i32 : i32, i32
  }
}

</mosaic_0001>

<bundles_post_ra>
// kernel: tpu_custom_call.1
= control target key start
LH: loop header
LB: loop body
LE: loop exit
PB: predicated region body
PF: predicated region fallthrough
CT: control target
= control target key end

     0   :  { %s300_s12 = smov [#allocation3]   ;;  %s339_s0 = inlined_call_operand.hbm [shape: s32[8], index: 0, kind: input, shape index: {}]   ;;  %s340_s1 = inlined_call_operand.hbm [shape: f32[8,1024], index: 1, kind: input, shape index: {}]   ;;  %s341_s2 = inlined_call_operand.hbm [shape: f32[8,1024], index: 2, kind: output, shape index: {}]  }
   0x1   :  { %s8_s11 = sshll.u32 %s339_s0, 4  ;;  %s9_s11 = int_to_ptr.hbm [resolvable:$true] %s8_s11 }
   0x2   :  { %11 = dma.hbm_to_smem %s9_s11, 16, %s300_s12, [#allocation2] }
   0x3   :  { %294 = dma.done.wait [#allocation2], 16 }
   0x4   :  { %295 = vsyncadd [#allocation2], 4294967280 }
   0x5   :  { %14 = sfence }
   0x6   :  { %15 = vsyncpa [#allocation5], 0 }
   0x7   :  { %16 = vsyncpa [#allocation6], 0  ;;  %s22_s15 = sshll.u32 %s340_s1, 4  ;;  %s301_s16 = smov [#allocation4]   ;;  %s23_s15 = int_to_ptr.hbm [resolvable:$true] %s22_s15 }
   0x8   :  { %s24_s17 = sshll.u32 %s301_s16, 4  ;;  %s25_s17 = int_to_ptr.vmem [resolvable:$true] %s24_s17 }
   0x9   :  { %27 = dma.hbm_to_vmem [thread:$0]  %s23_s15, 1024, %s25_s17, [#allocation5]  }
   0xa   :  { %296 = dma.done.wait [#allocation5], 1024  }
   0xb   :  { %297 = vsyncadd [#allocation5], 4294966272  ;;  %s33_s0 = sld [smem:[#allocation3]] }
   0xc   :  { %s202_s18 = sld [smem:[#allocation3 + $0x1]] }
   0xd   :  { %s205_s19 = sld [smem:[#allocation3 + $0x2]] }
   0xe   :  { %s324_s20 = sld [smem:[#allocation3 + $0x3]] }
   0xf   :  { %s326_s21 = sld [smem:[#allocation3 + $0x4]] }
  0x10   :  { %s328_s22 = sld [smem:[#allocation3 + $0x5]] }
  0x11   :  { %s34_s23 = sshra.s32 %s33_s0, 3  ;;  %s37_s24 = sand.u32 7, %s33_s0 }
  0x12   :  { %s223_s25 = sshll.u32 %s34_s23, 6  ;;  %s49_s1 = sshra.s32 %s202_s18, 3 }
  0x13   :  { %s40_s26 = sadd.s32 %s223_s25, %s37_s24  ;;  %s52_s27 = sand.u32 7, %s202_s18 }
  0x14   :  { %s224_s28 = sshll.u32 %s49_s1, 6  ;;  %s41_s29 = scalar_lea.vmem [#allocation4], %s40_s26 }
  0x15   :  { %v42_v0 = vld [vmem:[%s41_s29] ss:$8 sm:$0xf]  ;;  %s55_s30 = sadd.s32 %s224_s28, %s52_s27  ;;  %s65_s3 = sshra.s32 %s205_s19, 3 }
  0x16   :  { %v43_v1 = vld [vmem:[%s41_s29] ss:$8 sm:$0xf0]  ;;  %s56_s4 = scalar_lea.vmem [#allocation4], %s55_s30  ;;  %s68_s5 = sand.u32 7, %s205_s19 }
  0x17   :  { %v44_v2 = vor.u32 %v43_v1, %v42_v0  ;;  %v57_v3 = vld [vmem:[%s56_s4] ss:$8 sm:$0xf]  ;;  %s225_s6 = sshll.u32 %s65_s3, 6  ;;  %s81_s8 = sshra.s32 %s324_s20, 3 }
  0x18   :  { %v58_v4 = vld [vmem:[%s56_s4] ss:$8 sm:$0xf0]  ;;  %s71_s7 = sadd.s32 %s225_s6, %s68_s5  ;;  %s84_s9 = sand.u32 7, %s324_s20 }
  0x19   :  { %45 = vst [vmem:[#allocation7] ss:$8 sm:$0xf] %v44_v2  ;;  %v59_v5 = vor.u32 %v58_v4, %v57_v3  ;;  %s72_s10 = scalar_lea.vmem [#allocation4], %s71_s7  ;;  %s226_s11 = sshll.u32 %s81_s8, 6 }
  0x1a   :  { %46 = vst [vmem:[#allocation7] ss:$8 sm:$0xf0] %v44_v2  ;;  %v73_v6 = vld [vmem:[%s72_s10] ss:$8 sm:$0xf]  ;;  %s87_s13 = sadd.s32 %s226_s11, %s84_s9 }
  0x1b   :  { %61 = vst [vmem:[#allocation7 + $0x1] ss:$8 sm:$0xf] %v59_v5  ;;  %v74_v7 = vld [vmem:[%s72_s10] ss:$8 sm:$0xf0] }
  0x1c   :  { %62 = vst [vmem:[#allocation7 + $0x1] ss:$8 sm:$0xf0] %v59_v5  ;;  %s97_s12 = sshra.s32 %s326_s21, 3  ;;  %v75_v8 = vor.u32 %v74_v7, %v73_v6  ;;  %s100_s14 = sand.u32 7, %s326_s21 }
  0x1d   :  { %s227_s15 = sshll.u32 %s97_s12, 6  ;;  %s88_s16 = scalar_lea.vmem [#allocation4], %s87_s13 }
  0x1e   :  { %77 = vst [vmem:[#allocation7 + $0x2] ss:$8 sm:$0xf] %v75_v8  ;;  %v89_v9 = vld [vmem:[%s88_s16] ss:$8 sm:$0xf]  ;;  %s103_s17 = sadd.s32 %s227_s15, %s100_s14 }
  0x1f   :  { %78 = vst [vmem:[#allocation7 + $0x2] ss:$8 sm:$0xf0] %v75_v8  ;;  %v90_v10 = vld [vmem:[%s88_s16] ss:$8 sm:$0xf0] }
  0x20   :  { %v91_v11 = vor.u32 %v90_v10, %v89_v9  ;;  %s113_s0 = sshra.s32 %s328_s22, 3  ;;  %s104_s18 = scalar_lea.vmem [#allocation4], %s103_s17 }
  0x21   :  { %v105_v12 = vld [vmem:[%s104_s18] ss:$8 sm:$0xf]  ;;  %s116_s19 = sand.u32 7, %s328_s22  ;;  %s228_s20 = sshll.u32 %s113_s0, 6 }
  0x22   :  { %v106_v13 = vld [vmem:[%s104_s18] ss:$8 sm:$0xf0]  ;;  %93 = vst [vmem:[#allocation7 + $0x3] ss:$8 sm:$0xf] %v91_v11  ;;  %s119_s23 = sadd.s32 %s228_s20, %s116_s19 }
  0x23   :  { %v107_v14 = vor.u32 %v106_v13, %v105_v12  ;;  %94 = vst [vmem:[#allocation7 + $0x3] ss:$8 sm:$0xf0] %v91_v11  ;;  %s217_s24 = sld [smem:[#allocation3 + $0x6]]  ;;  %s120_s25 = scalar_lea.vmem [#allocation4], %s119_s23 }
  0x24   :  { %s220_s21 = sld [smem:[#allocation3 + $0x7]]  ;;  %v121_v15 = vld [vmem:[%s120_s25] ss:$8 sm:$0xf]  ;;  %s166_s27 = sshll.u32 %s341_s2, 4  ;;  %s167_s27 = int_to_ptr.hbm [resolvable:$true] %s166_s27 }
  0x25   :  { %109 = vst [vmem:[#allocation7 + $0x4] ss:$8 sm:$0xf] %v107_v14  ;;  %v122_v16 = vld [vmem:[%s120_s25] ss:$8 sm:$0xf0] }
  0x26   :  { %110 = vst [vmem:[#allocation7 + $0x4] ss:$8 sm:$0xf0] %v107_v14  ;;  %v123_v17 = vor.u32 %v122_v16, %v121_v15  ;;  %s302_s8 = smov [#allocation7]  }
  0x27   :  { %s164_s9 = sshll.u32 %s302_s8, 4  ;;  %s165_s9 = int_to_ptr.vmem [resolvable:$true] %s164_s9 }
  0x28   :  { %125 = vst [vmem:[#allocation7 + $0x5] ss:$8 sm:$0xf] %v123_v17 }
  0x29   :  { %s129_s28 = sshra.s32 %s217_s24, 3  ;;  %s132_s29 = sand.u32 7, %s217_s24  ;;  %126 = vst [vmem:[#allocation7 + $0x5] ss:$8 sm:$0xf0] %v123_v17 }
  0x2a   :  { %s229_s22 = sshll.u32 %s129_s28, 6  ;;  %s145_s30 = sshra.s32 %s220_s21, 3 }
  0x2b   :  { %s135_s3 = sadd.s32 %s229_s22, %s132_s29  ;;  %s148_s4 = sand.u32 7, %s220_s21 }
  0x2c   :  { %s230_s5 = sshll.u32 %s145_s30, 6  ;;  %s136_s6 = scalar_lea.vmem [#allocation4], %s135_s3 }
  0x2d   :  { %v137_v18 = vld [vmem:[%s136_s6] ss:$8 sm:$0xf]  ;;  %s151_s7 = sadd.s32 %s230_s5, %s148_s4 }
  0x2e   :  { %v138_v19 = vld [vmem:[%s136_s6] ss:$8 sm:$0xf0]  ;;  %s152_s10 = scalar_lea.vmem [#allocation4], %s151_s7 }
  0x2f   :  { %v139_v20 = vor.u32 %v138_v19, %v137_v18  ;;  %v153_v21 = vld [vmem:[%s152_s10] ss:$8 sm:$0xf] }
  0x30   :  { %v154_v22 = vld [vmem:[%s152_s10] ss:$8 sm:$0xf0] }
  0x31   :  { %141 = vst [vmem:[#allocation7 + $0x6] ss:$8 sm:$0xf] %v139_v20  ;;  %v155_v23 = vor.u32 %v154_v22, %v153_v21 }
  0x32   :  { %142 = vst [vmem:[#allocation7 + $0x6] ss:$8 sm:$0xf0] %v139_v20 }
  0x33   :  { %157 = vst [vmem:[#allocation7 + $0x7] ss:$8 sm:$0xf] %v155_v23 }
  0x34   :  { %158 = vst [vmem:[#allocation7 + $0x7] ss:$8 sm:$0xf0] %v155_v23 }
  0x35   :  { %169 = dma.vmem_to_hbm [thread:$0]  %s165_s9, 1024, %s167_s27, [#allocation6]  }
  0x36   :  { %298 = dma.done.wait [#allocation6], 1024  }
  0x37   :  { %299 = vsyncadd [#allocation6], 4294966272 }
  0x38   :  { %174 = vsyncpa [#allocation5], 1 }
  0x39   :  { %175 = vsyncpa [#allocation6], 1 }

</bundles_post_ra>
